<compile_context>
chip_gen: v7x
topology: tpu7x:2x2x1
jax: 0.10.0
libtpu: 0.0.40
codegen_flags: <defaults>
</compile_context>

<pallas_src>
import jax
import jax.numpy as jnp
from jax.experimental import pallas as pl
from jax.experimental.pallas import tpu as pltpu

LATENT_DIM = 64
HIDDEN_DIM = 400
OUTPUT_DIM = 784           # 1 * 28 * 28
DATA_SIZE = (1, 28, 28)

HIDDEN_PAD = 512           # lane-dense hidden width used inside the kernel
MAX_BATCH_TILE = 512       # bigger slab per grid step; well within VMEM on all chips


def _round_up(x, m):
    return ((x + m - 1) // m) * m


def _choose_block_b(b_pad):
    """Sublane-aligned batch tile.

    Prefer >= 2 grid steps (so v7x's second TensorCore gets work and DMAs
    pipeline), capped at MAX_BATCH_TILE.  Tiny batches stay a single step.
    """
    if b_pad < 16:
        return b_pad
    half = _round_up((b_pad + 1) // 2, 8)
    return min(MAX_BATCH_TILE, half)


def mnist_decoder_kernel(z_ref, w1_ref, b1_ref, w2_ref, b2_ref, o_ref):
    """Fused (z @ W1 + b1) -> ReLU -> (@ W2 + b2) -> sigmoid for one batch tile.

    z_ref : (Bt, 64)        f32  VMEM   (batch tile)
    w1_ref: (64, 512)       bf16 VMEM   (grid-invariant, VMEM resident)
    b1_ref: (1, 512)        f32  VMEM
    w2_ref: (512, 784)      bf16 VMEM
    b2_ref: (1, 784)        f32  VMEM
    o_ref : (Bt, 784)       f32  VMEM   (unpadded output width)
    """
    z = z_ref[...].astype(jnp.bfloat16)
    # Hidden layer: bf16 MXU matmul with f32 accumulation, bias + ReLU on VPU.
    h = jnp.dot(z, w1_ref[...], preferred_element_type=jnp.float32)
    h = jnp.maximum(h + b1_ref[...], 0.0)
    # Output layer: bf16 MXU matmul, f32 bias add.
    y = jnp.dot(h.astype(jnp.bfloat16), w2_ref[...],
                preferred_element_type=jnp.float32)
    y = y + b2_ref[...]
    # sigmoid(y) == 0.5 * tanh(0.5 * y) + 0.5 : one EUP op per element, no overflow.
    o_ref[...] = 0.5 * jnp.tanh(0.5 * y) + 0.5


def mnist_decoder_forward(z, kernel_params):
    """z: (..., LATENT_DIM) float -> (..., 1, 28, 28) float32."""
    w1, b1, w2, b2 = kernel_params  # padded / bf16 weights, f32 biases
    lead = z.shape[:-1]
    z2d = z.reshape(-1, LATENT_DIM).astype(jnp.float32)
    B = z2d.shape[0]

    # Batch tiling: sublane-aligned, padded so every block is full.
    b_align = _round_up(max(B, 1), 8)
    block_b = _choose_block_b(b_align)
    B_pad = _round_up(b_align, block_b)
    if B_pad != B:
        z2d = jnp.pad(z2d, ((0, B_pad - B), (0, 0)))
    grid = (B_pad // block_b,)

    cost = pl.CostEstimate(
        flops=2 * B_pad * (LATENT_DIM * HIDDEN_PAD + HIDDEN_PAD * OUTPUT_DIM),
        transcendentals=B_pad * OUTPUT_DIM,          # one tanh per output element
        bytes_accessed=(z2d.size * 4 + w1.size * 2 + w2.size * 2
                        + b1.size * 4 + b2.size * 4 + B_pad * OUTPUT_DIM * 4),
    )

    out = pl.pallas_call(
        mnist_decoder_kernel,
        out_shape=jax.ShapeDtypeStruct((B_pad, OUTPUT_DIM), jnp.float32),
        grid=grid,
        in_specs=[
            pl.BlockSpec((block_b, LATENT_DIM), lambda i: (i, 0)),
            pl.BlockSpec((LATENT_DIM, HIDDEN_PAD), lambda i: (0, 0)),
            pl.BlockSpec((1, HIDDEN_PAD), lambda i: (0, 0)),
            pl.BlockSpec((HIDDEN_PAD, OUTPUT_DIM), lambda i: (0, 0)),
            pl.BlockSpec((1, OUTPUT_DIM), lambda i: (0, 0)),
        ],
        out_specs=pl.BlockSpec((block_b, OUTPUT_DIM), lambda i: (i, 0)),
        compiler_params=pltpu.CompilerParams(
            dimension_semantics=("parallel",),       # megacore sharding on v7x
            vmem_limit_bytes=32 * 1024 * 1024,       # covers 512-row tiles on v5e too
        ),
        cost_estimate=cost,
    )(z2d, w1, b1, w2, b2)

    # Only batch padding (if any) is dropped; no column slice copy anymore.
    if B_pad != B:
        out = out[:B]
    return out.reshape(*lead, *DATA_SIZE)


def init_params(key):
    """Deterministic synthetic f32 params, torch.nn.Linear-style uniform(-1/sqrt(fan_in)).

    Stored transposed vs torch (in_features, out_features) so the kernel does z @ W.
    """
    k1, k2, k3, k4 = jax.random.split(key, 4)
    bound1 = 1.0 / (LATENT_DIM ** 0.5)
    bound2 = 1.0 / (HIDDEN_DIM ** 0.5)
    w1 = jax.random.uniform(k1, (LATENT_DIM, HIDDEN_DIM), jnp.float32, -bound1, bound1)
    b1 = jax.random.uniform(k2, (1, HIDDEN_DIM), jnp.float32, -bound1, bound1)
    w2 = jax.random.uniform(k3, (HIDDEN_DIM, OUTPUT_DIM), jnp.float32, -bound2, bound2)
    b2 = jax.random.uniform(k4, (1, OUTPUT_DIM), jnp.float32, -bound2, bound2)
    return w1, b1, w2, b2


def prepare_params(params_f32):
    """Zero-pad the hidden dim to a lane multiple and cast weights to bf16.

    Output dim stays at 784 (unpadded) so the kernel writes the exact output.
    Padded W1 columns / b1 entries are zero -> ReLU gives 0 there; padded W2
    rows are zero -> they contribute nothing.  Semantics unchanged.
    """
    w1, b1, w2, b2 = params_f32
    w1p = jnp.pad(w1, ((0, 0), (0, HIDDEN_PAD - HIDDEN_DIM))).astype(jnp.bfloat16)
    b1p = jnp.pad(b1, ((0, 0), (0, HIDDEN_PAD - HIDDEN_DIM))).astype(jnp.float32)
    w2p = jnp.pad(w2, ((0, HIDDEN_PAD - HIDDEN_DIM), (0, 0))).astype(jnp.bfloat16)
    b2p = b2.astype(jnp.float32)
    return w1p, b1p, w2p, b2p


def reference_forward(z, params_f32):
    """Pure-JAX f32 reference (original torch semantics) for correctness check."""
    w1, b1, w2, b2 = params_f32
    lead = z.shape[:-1]
    z2d = z.reshape(-1, LATENT_DIM).astype(jnp.float32)
    h = jnp.maximum(z2d @ w1 + b1, 0.0)
    y = jax.nn.sigmoid(h @ w2 + b2)
    return y.reshape(*lead, *DATA_SIZE)


if __name__ == "__main__":
    key = jax.random.PRNGKey(0)
    pkey, zkey1, zkey2 = jax.random.split(key, 3)
    params_f32 = init_params(pkey)
    params_kernel = prepare_params(params_f32)

    # Small-batch latency path (single grid step).
    B1 = 8
    z1 = jax.random.normal(zkey1, (B1, LATENT_DIM), jnp.float32)
    out1 = jax.block_until_ready(mnist_decoder_forward(z1, params_kernel))
    assert out1.shape == (B1, 1, 28, 28), out1.shape
    err1 = float(jnp.max(jnp.abs(out1 - reference_forward(z1, params_f32))))

    # Multi-step grid path with batch padding (B not a multiple of the tile).
    B2 = 20
    z2 = jax.random.normal(zkey2, (B2, LATENT_DIM), jnp.float32)
    out2 = jax.block_until_ready(mnist_decoder_forward(z2, params_kernel))
    assert out2.shape == (B2, 1, 28, 28), out2.shape
    err2 = float(jnp.max(jnp.abs(out2 - reference_forward(z2, params_f32))))

    max_err = max(err1, err2)
    # Loose tolerance: kernel uses bf16 weights / bf16 activations into the MXU.
    assert max_err < 2e-2, f"mismatch vs f32 reference: max abs err {max_err}"

    print("KERNEL_OK")
</pallas_src>

<mosaic_0001>
module attributes {stable_mosaic.version = 11 : i64} {
  func.func @mnist_decoder_kernel(%arg0: i32, %arg1: memref<8x64xf32, #tpu.memory_space<vmem>>, %arg2: memref<64x512xbf16, #tpu.memory_space<vmem>>, %arg3: memref<1x512xf32, #tpu.memory_space<vmem>>, %arg4: memref<512x784xbf16, #tpu.memory_space<vmem>>, %arg5: memref<1x784xf32, #tpu.memory_space<vmem>>, %arg6: memref<8x784xf32, #tpu.memory_space<vmem>>) attributes {dimension_semantics = [#tpu.dimension_semantics<parallel>], iteration_bounds = array<i64: 1>, scalar_prefetch = 0 : i64, scratch_operands = 0 : i64, tpu.core_type = #tpu.core_type<tc>, window_params = [{transform_indices = @transform_0, window_bounds = array<i64: 8, 64>}, {pipeline_mode = #tpu.pipeline_mode<synchronous>, transform_indices = @transform_1, window_bounds = array<i64: 64, 512>}, {pipeline_mode = #tpu.pipeline_mode<synchronous>, transform_indices = @transform_2, window_bounds = array<i64: 1, 512>}, {pipeline_mode = #tpu.pipeline_mode<synchronous>, transform_indices = @transform_3, window_bounds = array<i64: 512, 784>}, {pipeline_mode = #tpu.pipeline_mode<synchronous>, transform_indices = @transform_4, window_bounds = array<i64: 1, 784>}, {transform_indices = @transform_5, window_bounds = array<i64: 8, 784>}]} {
    %c0 = arith.constant 0 : index
    %c0_0 = arith.constant 0 : index
    %0 = vector.load %arg1[%c0, %c0_0] : memref<8x64xf32, #tpu.memory_space<vmem>>, vector<8x64xf32>
    %1 = arith.truncf %0 : vector<8x64xf32> to vector<8x64xbf16>
    %c0_1 = arith.constant 0 : index
    %c0_2 = arith.constant 0 : index
    %2 = vector.load %arg2[%c0_1, %c0_2] : memref<64x512xbf16, #tpu.memory_space<vmem>>, vector<64x512xbf16>
    %cst = arith.constant dense<0.000000e+00> : vector<8x512xf32>
    %3 = tpu.matmul %1, %2, %cst {dimension_numbers = #tpu.dot_dimension_numbers<[1], [0], [0], [1], [0, 0, 1, 1], [], []>} : vector<8x64xbf16>, vector<64x512xbf16>, vector<8x512xf32> -> vector<8x512xf32>
    %c0_3 = arith.constant 0 : index
    %c0_4 = arith.constant 0 : index
    %4 = vector.load %arg3[%c0_3, %c0_4] : memref<1x512xf32, #tpu.memory_space<vmem>>, vector<1x512xf32>
    %5 = vector.broadcast %4 : vector<1x512xf32> to vector<8x512xf32>
    %6 = arith.addf %3, %5 : vector<8x512xf32>
    %cst_5 = arith.constant 0.000000e+00 : f32
    %7 = vector.broadcast %cst_5 : f32 to vector<8x512xf32>
    %8 = arith.maximumf %6, %7 : vector<8x512xf32>
    %9 = arith.truncf %8 : vector<8x512xf32> to vector<8x512xbf16>
    %c0_6 = arith.constant 0 : index
    %c0_7 = arith.constant 0 : index
    %10 = vector.load %arg4[%c0_6, %c0_7] : memref<512x784xbf16, #tpu.memory_space<vmem>>, vector<512x784xbf16>
    %cst_8 = arith.constant dense<0.000000e+00> : vector<8x784xf32>
    %11 = tpu.matmul %9, %10, %cst_8 {dimension_numbers = #tpu.dot_dimension_numbers<[1], [0], [0], [1], [0, 0, 1, 1], [], []>} : vector<8x512xbf16>, vector<512x784xbf16>, vector<8x784xf32> -> vector<8x784xf32>
    %c0_9 = arith.constant 0 : index
    %c0_10 = arith.constant 0 : index
    %12 = vector.load %arg5[%c0_9, %c0_10] : memref<1x784xf32, #tpu.memory_space<vmem>>, vector<1x784xf32>
    %13 = vector.broadcast %12 : vector<1x784xf32> to vector<8x784xf32>
    %14 = arith.addf %11, %13 : vector<8x784xf32>
    %cst_11 = arith.constant 5.000000e-01 : f32
    %15 = vector.broadcast %cst_11 : f32 to vector<8x784xf32>
    %16 = arith.mulf %15, %14 : vector<8x784xf32>
    %17 = math.tanh %16 : vector<8x784xf32>
    %cst_12 = arith.constant 5.000000e-01 : f32
    %18 = vector.broadcast %cst_12 : f32 to vector<8x784xf32>
    %19 = arith.mulf %18, %17 : vector<8x784xf32>
    %cst_13 = arith.constant 5.000000e-01 : f32
    %20 = vector.broadcast %cst_13 : f32 to vector<8x784xf32>
    %21 = arith.addf %19, %20 : vector<8x784xf32>
    %c0_14 = arith.constant 0 : index
    %c0_15 = arith.constant 0 : index
    %22 = vector.load %arg6[%c0_14, %c0_15] : memref<8x784xf32, #tpu.memory_space<vmem>>, vector<8x784xf32>
    tpu.vector_store %arg6[%c0_14, %c0_15], %21 {strides = array<i32>} : memref<8x784xf32, #tpu.memory_space<vmem>>, vector<8x784xf32>,
    return
  }
  func.func @transform_0(%arg0: i32) -> (i32, i32) {
    %c0_i32 = arith.constant 0 : i32
    %c0_i32_0 = arith.constant 0 : i32
    return %arg0, %c0_i32 : i32, i32
  }
  func.func @transform_1(%arg0: i32) -> (i32, i32) {
    %c0_i32 = arith.constant 0 : i32
    %c0_i32_0 = arith.constant 0 : i32
    %c0_i32_1 = arith.constant 0 : i32
    return %c0_i32, %c0_i32_0 : i32, i32
  }
  func.func @transform_2(%arg0: i32) -> (i32, i32) {
    %c0_i32 = arith.constant 0 : i32
    %c0_i32_0 = arith.constant 0 : i32
    %c0_i32_1 = arith.constant 0 : i32
    return %c0_i32, %c0_i32_0 : i32, i32
  }
  func.func @transform_3(%arg0: i32) -> (i32, i32) {
    %c0_i32 = arith.constant 0 : i32
    %c0_i32_0 = arith.constant 0 : i32
    %c0_i32_1 = arith.constant 0 : i32
    return %c0_i32, %c0_i32_0 : i32, i32
  }
  func.func @transform_4(%arg0: i32) -> (i32, i32) {
    %c0_i32 = arith.constant 0 : i32
    %c0_i32_0 = arith.constant 0 : i32
    %c0_i32_1 = arith.constant 0 : i32
    return %c0_i32, %c0_i32_0 : i32, i32
  }
  func.func @transform_5(%arg0: i32) -> (i32, i32) {
    %c0_i32 = arith.constant 0 : i32
    %c0_i32_0 = arith.constant 0 : i32
    return %arg0, %c0_i32 : i32, i32
  }
}

</mosaic_0001>

<bundles_post_ra>
// kernel: tpu_custom_call.1
= control target key start
LH: loop header
LB: loop body
LE: loop exit
PB: predicated region body
PF: predicated region fallthrough
CT: control target
= control target key end

     0   :  { %v2745_v2 = vmov 0   ;;  %vm142_vm0 = vcmask 523264   ;;  %s3587_s0 = inlined_call_operand.vmem [shape: f32[8,64], index: 0, kind: input, shape index: {}]   ;;  %s3588_s1 = inlined_call_operand.vmem [shape: bf16[64,512], index: 1, kind: input, shape index: {}]   ;;  %s3589_s2 = inlined_call_operand.vmem [shape: f32[1,512], index: 2, kind: input, shape index: {}]   ;;  %s3590_s3 = inlined_call_operand.vmem [shape: bf16[512,784], index: 3, kind: input, shape index: {}]   ;;  %s3591_s4 = inlined_call_operand.vmem [shape: f32[1,784], index: 4, kind: input, shape index: {}]   ;;  %s3592_s5 = inlined_call_operand.hbm [shape: f32[8,784], index: 5, kind: output, shape index: {}]  }
   0x1   :  { %v2363_v0 = vld [vmem:[%s3588_s1 + $0x4] ss:$16 sps:$4 sm:$0xff]   ;;  %v2365_v1 = vld [vmem:[%s3588_s1] ss:$16 sps:$4 sm:$0xff]   ;;  %178 = vmatprep.mubr.bf16.mxu1 %v2745_v2  ;;  %v2377_v11 = vld [vmem:[%s3588_s1 + $0xc] ss:$16 sps:$4 sm:$0xff]  }
   0x2   :  { %146 = vmatprep.subr.bf16.mxu1 %v2363_v0  ;;  %v2366_v3 = vld [vmem:[%s3588_s1 + $0x24] ss:$16 sps:$4 sm:$0xff]   ;;  %v2368_v4 = vld [vmem:[%s3588_s1 + $0x20] ss:$16 sps:$4 sm:$0xff]   ;;  %v2393_v14 = vld [vmem:[%s3590_s3 + $0x3c] ss:$28 sps:$4 sm:$0xff]  }
   0x3   :  { %147 = vmatpush1.bf16.msra.mxu1 %v2365_v1  ;;  %v2369_v5 = vld [vmem:[%s3588_s1 + $0x44] ss:$16 sps:$4 sm:$0xff]   ;;  %v2371_v6 = vld [vmem:[%s3588_s1 + $0x40] ss:$16 sps:$4 sm:$0xff]   ;;  %v2375_v15 = vld [vmem:[%s3588_s1 + $0x8] ss:$16 sps:$4 sm:$0xff]  }
   0x4   :  { %148 = vmatprep.subr.bf16.mxu1 %v2366_v3  ;;  %v2372_v7 = vld [vmem:[%s3588_s1 + $0x64] ss:$16 sps:$4 sm:$0xff]   ;;  %v2374_v8 = vld [vmem:[%s3588_s1 + $0x60] ss:$16 sps:$4 sm:$0xff]   ;;  %v2380_v16 = vld [vmem:[%s3588_s1 + $0x2c] ss:$16 sps:$4 sm:$0xff]  }
   0x5   :  { %v22_v9 = vld [vmem:[%s3587_s0] sm:$0xff]  ;;  %v2398_v17 = vld [vmem:[%s3590_s3 + $0x38] ss:$28 sps:$4 sm:$0xff]   ;;  %v2383_v20 = vld [vmem:[%s3588_s1 + $0x4c] ss:$16 sps:$4 sm:$0xff]  }
   0x6   :  { %v2387_v10 = vld [vmem:[%s3590_s3 + $0x4] ss:$28 sps:$4 sm:$0xff]   ;;  %v23_v13 = vpack.c.bf16 %v22_v9, %v22_v9  ;;  %v2399_v18 = vld [vmem:[%s3590_s3 + $0x74] ss:$28 sps:$4 sm:$0xff]   ;;  %v2378_v19 = vld [vmem:[%s3588_s1 + $0x28] ss:$16 sps:$4 sm:$0xff]  }
   0x7   :  { %149 = vmatpush1.bf16.msra.mxu1 %v2368_v4  ;;  %1681 = vmatprep.subr.bf16.mxu0 %v2387_v10  ;;  %v2392_v12 = vld [vmem:[%s3590_s3] ss:$28 sps:$4 sm:$0xff]   ;;  %v2404_v21 = vld [vmem:[%s3590_s3 + $0x70] ss:$28 sps:$4 sm:$0xff]   ;;  %v2381_v23 = vld [vmem:[%s3588_s1 + $0x48] ss:$16 sps:$4 sm:$0xff]  }
   0x8   :  { %150 = vmatprep.subr.bf16.mxu1 %v2369_v5  ;;  %1682 = vmatpush1.bf16.msra.mxu0 %v2392_v12  ;;  %v2405_v22 = vld [vmem:[%s3590_s3 + $0xac] ss:$28 sps:$4 sm:$0xff]   ;;  %v2411_v26 = vld [vmem:[%s3590_s3 + $0xe4] ss:$28 sps:$4 sm:$0xff]   ;;  %v2417_v30 = vld [vmem:[%s3590_s3 + $0x11c] ss:$28 sps:$4 sm:$0xff]  }
   0x9   :  { %1683 = vmatprep.subr.bf16.mxu0 %v2393_v14  ;;  %v2386_v24 = vld [vmem:[%s3588_s1 + $0x6c] ss:$16 sps:$4 sm:$0xff]   ;;  %v2410_v25 = vld [vmem:[%s3590_s3 + $0xa8] ss:$28 sps:$4 sm:$0xff]   ;;  %v2422_v33 = vld [vmem:[%s3590_s3 + $0x118] ss:$28 sps:$4 sm:$0xff]  }
   0xa   :  { %v2384_v27 = vld [vmem:[%s3588_s1 + $0x68] ss:$16 sps:$4 sm:$0xff]   ;;  %v2416_v29 = vld [vmem:[%s3590_s3 + $0xe0] ss:$28 sps:$4 sm:$0xff]   ;;  %v2423_v34 = vld [vmem:[%s3590_s3 + $0x154] ss:$28 sps:$4 sm:$0xff]  }
   0xb   :  { %151 = vmatpush1.bf16.msra.mxu1 %v2371_v6  ;;  %v2391_v28 = vld [vmem:[%s3590_s3 + $0xc] ss:$28 sps:$4 sm:$0xff]   ;;  %v2397_v32 = vld [vmem:[%s3590_s3 + $0x44] ss:$28 sps:$4 sm:$0xff]   ;;  %v2403_v36 = vld [vmem:[%s3590_s3 + $0x7c] ss:$28 sps:$4 sm:$0xff]  }
   0xc   :  { %152 = vmatprep.subr.bf16.mxu1 %v2372_v7  ;;  %1684 = vmatpush1.bf16.msra.mxu0 %v2398_v17  ;;  %v2389_v31 = vld [vmem:[%s3590_s3 + $0x8] ss:$28 sps:$4 sm:$0xff]   ;;  %v2395_v35 = vld [vmem:[%s3590_s3 + $0x40] ss:$28 sps:$4 sm:$0xff]   ;;  %v2428_v37 = vld [vmem:[%s3590_s3 + $0x150] ss:$28 sps:$4 sm:$0xff]  }
   0xd   :  { %1685 = vmatprep.subr.bf16.mxu0 %v2399_v18  ;;  %v2429_v38 = vld [vmem:[%s3590_s3 + $0x18c] ss:$28 sps:$4 sm:$0xff]   ;;  %v2401_v39 = vld [vmem:[%s3590_s3 + $0x78] ss:$28 sps:$4 sm:$0xff]   ;;  %v2435_v42 = vld [vmem:[%s3590_s3 + $0x1c4] ss:$28 sps:$4 sm:$0xff]  }
   0xe   :  { %v2409_v40 = vld [vmem:[%s3590_s3 + $0xb4] ss:$28 sps:$4 sm:$0xff]   ;;  %v2434_v41 = vld [vmem:[%s3590_s3 + $0x188] ss:$28 sps:$4 sm:$0xff]   ;;  %v2440_v45 = vld [vmem:[%s3590_s3 + $0x1c0] ss:$28 sps:$4 sm:$0xff]  }
   0xf   :  { %153 = vmatpush1.bf16.msra.mxu1 %v2374_v8  ;;  %v2407_v43 = vld [vmem:[%s3590_s3 + $0xb0] ss:$28 sps:$4 sm:$0xff]   ;;  %v2441_v46 = vld [vmem:[%s3590_s3 + $0x1fc] ss:$28 sps:$4 sm:$0xff]   ;;  %v2413_v47 = vld [vmem:[%s3590_s3 + $0xe8] ss:$28 sps:$4 sm:$0xff]  }
  0x10   :  { %187 = vmatprep.subr.bf16.mxu1 %v2377_v11  ;;  %1686 = vmatpush1.bf16.msra.mxu0 %v2404_v21  ;;  %v2415_v44 = vld [vmem:[%s3590_s3 + $0xec] ss:$28 sps:$4 sm:$0xff]   ;;  %v2421_v48 = vld [vmem:[%s3590_s3 + $0x124] ss:$28 sps:$4 sm:$0xff]   ;;  %v2446_v49 = vld [vmem:[%s3590_s3 + $0x1f8] ss:$28 sps:$4 sm:$0xff]  }
  0x11   :  { %1687 = vmatprep.subr.bf16.mxu0 %v2405_v22  ;;  %v2447_v50 = vld [vmem:[%s3590_s3 + $0x234] ss:$28 sps:$4 sm:$0xff]   ;;  %v2419_v51 = vld [vmem:[%s3590_s3 + $0x120] ss:$28 sps:$4 sm:$0xff]   ;;  %v2453_v54 = vld [vmem:[%s3590_s3 + $0x26c] ss:$28 sps:$4 sm:$0xff]  }
  0x12   :  { %2073 = vmatmul.mubr.msk.bf16.vlgmr.msra.gmra.mrb[0].mxu1 %vm142_vm0, %v23_v13  ;;  %v2427_v52 = vld [vmem:[%s3590_s3 + $0x15c] ss:$28 sps:$4 sm:$0xff]   ;;  %v2452_v53 = vld [vmem:[%s3590_s3 + $0x230] ss:$28 sps:$4 sm:$0xff]   ;;  %v2458_v57 = vld [vmem:[%s3590_s3 + $0x268] ss:$28 sps:$4 sm:$0xff]  }
  0x13   :  { %188 = vmatpush1.bf16.msra.mxu1 %v2375_v15  ;;  %219 = vmatprep.mubr.bf16.mxu1 %v2745_v2  ;;  %v2425_v55 = vld [vmem:[%s3590_s3 + $0x158] ss:$28 sps:$4 sm:$0xff]   ;;  %v2459_v58 = vld [vmem:[%s3590_s3 + $0x2a4] ss:$28 sps:$4 sm:$0xff]   ;;  %v2431_v59 = vld [vmem:[%s3590_s3 + $0x190] ss:$28 sps:$4 sm:$0xff]  }
  0x14   :  { %189 = vmatprep.subr.bf16.mxu1 %v2380_v16  ;;  %1688 = vmatpush1.bf16.msra.mxu0 %v2410_v25  ;;  %v2433_v56 = vld [vmem:[%s3590_s3 + $0x194] ss:$28 sps:$4 sm:$0xff]   ;;  %v2439_v60 = vld [vmem:[%s3590_s3 + $0x1cc] ss:$28 sps:$4 sm:$0xff]   ;;  %v2464_v61 = vld [vmem:[%s3590_s3 + $0x2a0] ss:$28 sps:$4 sm:$0xff]  }
  0x15   :  { %1689 = vmatprep.subr.bf16.mxu0 %v2411_v26  ;;  %v2465_v62 = vld [vmem:[%s3590_s3 + $0x2dc] ss:$28 sps:$4 sm:$0xff]   ;;  %v2437_v63 = vld [vmem:[%s3590_s3 + $0x1c8] ss:$28 sps:$4 sm:$0xff]   ;;  %v2457_v5 = vld [vmem:[%s3590_s3 + $0x274] ss:$28 sps:$4 sm:$0xff]  }
  0x16   :  { %v2445_v0 = vld [vmem:[%s3590_s3 + $0x204] ss:$28 sps:$4 sm:$0xff]   ;;  %v2470_v1 = vld [vmem:[%s3590_s3 + $0x2d8] ss:$28 sps:$4 sm:$0xff]   ;;  %v2455_v6 = vld [vmem:[%s3590_s3 + $0x270] ss:$28 sps:$4 sm:$0xff]  }
  0x17   :  { %190 = vmatpush1.bf16.msra.mxu1 %v2378_v19  ;;  %v2443_v2 = vld [vmem:[%s3590_s3 + $0x200] ss:$28 sps:$4 sm:$0xff]   ;;  %v2449_v4 = vld [vmem:[%s3590_s3 + $0x238] ss:$28 sps:$4 sm:$0xff]   ;;  %v2463_v7 = vld [vmem:[%s3590_s3 + $0x2ac] ss:$28 sps:$4 sm:$0xff]  }
  0x18   :  { %191 = vmatprep.subr.bf16.mxu1 %v2383_v20  ;;  %1690 = vmatpush1.bf16.msra.mxu0 %v2416_v29  ;;  %v2451_v3 = vld [vmem:[%s3590_s3 + $0x23c] ss:$28 sps:$4 sm:$0xff]   ;;  %v2461_v8 = vld [vmem:[%s3590_s3 + $0x2a8] ss:$28 sps:$4 sm:$0xff]   ;;  %v2471_v11 = vld [vmem:[%s3590_s3 + $0x314] ss:$28 sps:$4 sm:$0xff]  }
  0x19   :  { %1691 = vmatprep.subr.bf16.mxu0 %v2417_v30  ;;  %v2469_v9 = vld [vmem:[%s3590_s3 + $0x2e4] ss:$28 sps:$4 sm:$0xff]   ;;  %v2475_v12 = vld [vmem:[%s3590_s3 + $0x31c] ss:$28 sps:$4 sm:$0xff]   ;;  %v2476_v14 = vld [vmem:[%s3590_s3 + $0x310] ss:$28 sps:$4 sm:$0xff]  }
  0x1a   :  { %v2467_v10 = vld [vmem:[%s3590_s3 + $0x2e0] ss:$28 sps:$4 sm:$0xff]   ;;  %v2477_v15 = vld [vmem:[%s3590_s3 + $0x34c] ss:$28 sps:$4 sm:$0xff]   ;;  %v2481_v16 = vld [vmem:[%s3590_s3 + $0x354] ss:$28 sps:$4 sm:$0xff]  }
  0x1b   :  { %192 = vmatpush1.bf16.msra.mxu1 %v2381_v23  ;;  %v2479_v17 = vld [vmem:[%s3590_s3 + $0x350] ss:$28 sps:$4 sm:$0xff]   ;;  %v2482_v18 = vld [vmem:[%s3590_s3 + $0x348] ss:$28 sps:$4 sm:$0xff]  }
  0x1c   :  { %193 = vmatprep.subr.bf16.mxu1 %v2386_v24  ;;  %1692 = vmatpush1.bf16.msra.mxu0 %v2422_v33  ;;  %v2485_v19 = vld [vmem:[%s3590_s3 + $0x384] ss:$28 sps:$4 sm:$0xff]   ;;  %v2488_v20 = vld [vmem:[%s3590_s3 + $0x38c] ss:$28 sps:$4 sm:$0xff]  }
  0x1d   :  { %1693 = vmatprep.subr.bf16.mxu0 %v2423_v34 }
  0x1f   :  { %194 = vmatpush1.bf16.msra.mxu1 %v2384_v27 }
  0x20   :  { %1763 = vmatprep.subr.bf16.mxu1 %v2391_v28  ;;  %1694 = vmatpush1.bf16.msra.mxu0 %v2428_v37 }
  0x21   :  { %1695 = vmatprep.subr.bf16.mxu0 %v2429_v38 }
  0x22   :  { %2074 = vmatmul.mubr.msk.bf16.vlgmr.msra.gmra.mrb[4].mxu1 %vm142_vm0, %v23_v13  ;;  %v2473_v13 = vld [vmem:[%s3590_s3 + $0x318] ss:$28 sps:$4 sm:$0xff]  }
  0x23   :  { %1764 = vmatpush1.bf16.msra.mxu1 %v2389_v31 }
  0x24   :  { %1765 = vmatprep.subr.bf16.mxu1 %v2397_v32  ;;  %1696 = vmatpush1.bf16.msra.mxu0 %v2434_v41 }
  0x25   :  { %1697 = vmatprep.subr.bf16.mxu0 %v2435_v42 }
  0x27   :  { %1766 = vmatpush1.bf16.msra.mxu1 %v2395_v35 }
  0x28   :  { %1767 = vmatprep.subr.bf16.mxu1 %v2403_v36  ;;  %1698 = vmatpush1.bf16.msra.mxu0 %v2440_v45 }
  0x29   :  { %1699 = vmatprep.subr.bf16.mxu0 %v2441_v46 }
  0x2b   :  { %1768 = vmatpush1.bf16.msra.mxu1 %v2401_v39 }
  0x2c   :  { %1769 = vmatprep.subr.bf16.mxu1 %v2409_v40  ;;  %1700 = vmatpush1.bf16.msra.mxu0 %v2446_v49 }
  0x2d   :  { %1701 = vmatprep.subr.bf16.mxu0 %v2447_v50 }
  0x2f   :  { %1770 = vmatpush1.bf16.msra.mxu1 %v2407_v43 }
  0x30   :  { %1771 = vmatprep.subr.bf16.mxu1 %v2415_v44  ;;  %1702 = vmatpush1.bf16.msra.mxu0 %v2452_v53 }
  0x31   :  { %1703 = vmatprep.subr.bf16.mxu0 %v2453_v54 }
  0x33   :  { %1772 = vmatpush1.bf16.msra.mxu1 %v2413_v47 }
  0x34   :  { %1773 = vmatprep.subr.bf16.mxu1 %v2421_v48  ;;  %1704 = vmatpush1.bf16.msra.mxu0 %v2458_v57 }
  0x35   :  { %1705 = vmatprep.subr.bf16.mxu0 %v2459_v58 }
  0x37   :  { %1774 = vmatpush1.bf16.msra.mxu1 %v2419_v51 }
  0x38   :  { %1775 = vmatprep.subr.bf16.mxu1 %v2427_v52  ;;  %1706 = vmatpush1.bf16.msra.mxu0 %v2464_v61 }
  0x39   :  { %1707 = vmatprep.subr.bf16.mxu0 %v2465_v62 }
  0x3b   :  { %1776 = vmatpush1.bf16.msra.mxu1 %v2425_v55 }
  0x3c   :  { %1777 = vmatprep.subr.bf16.mxu1 %v2433_v56  ;;  %1708 = vmatpush1.bf16.msra.mxu0 %v2470_v1 }
  0x3d   :  { %1709 = vmatprep.subr.bf16.mxu0 %v2471_v11 }
  0x3f   :  { %1778 = vmatpush1.bf16.msra.mxu1 %v2431_v59 }
  0x40   :  { %1779 = vmatprep.subr.bf16.mxu1 %v2439_v60  ;;  %1710 = vmatpush1.bf16.msra.mxu0 %v2476_v14 }
  0x41   :  { %1711 = vmatprep.subr.bf16.mxu0 %v2477_v15 }
  0x43   :  { %1780 = vmatpush1.bf16.msra.mxu1 %v2437_v63 }
  0x44   :  { %1781 = vmatprep.subr.bf16.mxu1 %v2445_v0  ;;  %1712 = vmatpush1.bf16.msra.mxu0 %v2482_v18 }
  0x45   :  { %1722 = vmatprep.subr.bf16.mxu0 %v2485_v19 }
  0x47   :  { %1782 = vmatpush1.bf16.msra.mxu1 %v2443_v2 }
  0x48   :  { %1783 = vmatprep.subr.bf16.mxu1 %v2451_v3 }
  0x4b   :  { %1784 = vmatpush1.bf16.msra.mxu1 %v2449_v4 }
  0x4c   :  { %1785 = vmatprep.subr.bf16.mxu1 %v2457_v5 }
  0x4f   :  { %1786 = vmatpush1.bf16.msra.mxu1 %v2455_v6 }
  0x50   :  { %1787 = vmatprep.subr.bf16.mxu1 %v2463_v7 }
  0x53   :  { %1788 = vmatpush1.bf16.msra.mxu1 %v2461_v8 }
  0x54   :  { %1789 = vmatprep.subr.bf16.mxu1 %v2469_v9 }
  0x57   :  { %1790 = vmatpush1.bf16.msra.mxu1 %v2467_v10 }
  0x58   :  { %1791 = vmatprep.subr.bf16.mxu1 %v2475_v12 }
  0x5b   :  { %1792 = vmatpush1.bf16.msra.mxu1 %v2473_v13 }
  0x5c   :  { %1793 = vmatprep.subr.bf16.mxu1 %v2481_v16 }
  0x5f   :  { %1794 = vmatpush1.bf16.msra.mxu1 %v2479_v17 }
  0x60   :  { %1804 = vmatprep.subr.bf16.mxu1 %v2488_v20 }
  0x61   :  { %10 = vsyncpa [#allocation3], 0  ;;  %v42_v21 = vlaneseq  ;;  %v3034_v24 = vld [vmem:[%s3589_s2] sm:$0xf]  ;;  %v2486_v38 = vld [vmem:[%s3590_s3 + $0x388] ss:$28 sps:$4 sm:$0xff]  }
  0x62   :  { %v2483_v37 = vld [vmem:[%s3590_s3 + $0x380] ss:$28 sps:$4 sm:$0xff]   ;;  %v2489_v42 = vld [vmem:[%s3590_s3 + $0x3b8] ss:$28 sps:$4 sm:$0xff]   ;;  %v2495_v47 = vld [vmem:[%s3590_s3 + $0x3f0] ss:$28 sps:$4 sm:$0xff]  }
  0x63   :  { %v3028_v22 = vshrl.u32 %v42_v21, 7  ;;  %v2491_v40 = vld [vmem:[%s3590_s3 + $0x3bc] ss:$28 sps:$4 sm:$0xff]   ;;  %v2494_v41 = vld [vmem:[%s3590_s3 + $0x3c4] ss:$28 sps:$4 sm:$0xff]   ;;  %vm2041_vm1 = vcmask 130048  }
  0x64   :  { %v2492_v43 = vld [vmem:[%s3590_s3 + $0x3c0] ss:$28 sps:$4 sm:$0xff]   ;;  %v2497_v45 = vld [vmem:[%s3590_s3 + $0x3f4] ss:$28 sps:$4 sm:$0xff]   ;;  %v2503_v50 = vld [vmem:[%s3590_s3 + $0x42c] ss:$28 sps:$4 sm:$0xff]  }
  0x65   :  { %v44_v23 = vsub.s32 0, %v3028_v22  ;;  %v48_v25 = vsub.s32 1, %v3028_v22  ;;  %v56_v44 = vsub.s32 3, %v3028_v22  ;;  %v2500_v46 = vld [vmem:[%s3590_s3 + $0x3fc] ss:$28 sps:$4 sm:$0xff]  }
  0x66   :  { %v2498_v48 = vld [vmem:[%s3590_s3 + $0x3f8] ss:$28 sps:$4 sm:$0xff]   ;;  %v2501_v54 = vld [vmem:[%s3590_s3 + $0x428] ss:$28 sps:$4 sm:$0xff]   ;;  %v2504_v55 = vld [vmem:[%s3590_s3 + $0x430] ss:$28 sps:$4 sm:$0xff]  }
  0x67   :  { %v45_v26 = vrot.slane %v3034_v24, %v44_v23  ;;  %v49_v27 = vrot.slane %v3034_v24, %v48_v25  ;;  %v57_v49 = vrot.slane %v3034_v24, %v56_v44  ;;  %v2506_v51 = vld [vmem:[%s3590_s3 + $0x434] ss:$28 sps:$4 sm:$0xff]   ;;  %v2509_v58 = vld [vmem:[%s3590_s3 + $0x464] ss:$28 sps:$4 sm:$0xff]   ;;  %v2512_v59 = vld [vmem:[%s3590_s3 + $0x46c] ss:$28 sps:$4 sm:$0xff]  }
  0x68   :  { %v2507_v62 = vld [vmem:[%s3590_s3 + $0x460] ss:$28 sps:$4 sm:$0xff]   ;;  %v2510_v63 = vld [vmem:[%s3590_s3 + $0x468] ss:$28 sps:$4 sm:$0xff]   ;;  %v2513_v3 = vld [vmem:[%s3590_s3 + $0x498] ss:$28 sps:$4 sm:$0xff]  }
  0x69   :  { %v2515_v1 = vld [vmem:[%s3590_s3 + $0x49c] ss:$28 sps:$4 sm:$0xff]   ;;  %v2518_v2 = vld [vmem:[%s3590_s3 + $0x4a4] ss:$28 sps:$4 sm:$0xff]   ;;  %v2521_v5 = vld [vmem:[%s3590_s3 + $0x4d4] ss:$28 sps:$4 sm:$0xff]  }
  0x6a   :  { %v2516_v4 = vld [vmem:[%s3590_s3 + $0x4a0] ss:$28 sps:$4 sm:$0xff]   ;;  %v2519_v7 = vld [vmem:[%s3590_s3 + $0x4d0] ss:$28 sps:$4 sm:$0xff]   ;;  %v2522_v8 = vld [vmem:[%s3590_s3 + $0x4d8] ss:$28 sps:$4 sm:$0xff]  }
  0x6b   :  { %v2524_v6 = vld [vmem:[%s3590_s3 + $0x4dc] ss:$28 sps:$4 sm:$0xff]   ;;  %v2527_v9 = vld [vmem:[%s3590_s3 + $0x50c] ss:$28 sps:$4 sm:$0xff]   ;;  %v2530_v10 = vld [vmem:[%s3590_s3 + $0x514] ss:$28 sps:$4 sm:$0xff]  }
  0x6c   :  { %v2525_v11 = vld [vmem:[%s3590_s3 + $0x508] ss:$28 sps:$4 sm:$0xff]   ;;  %v2528_v12 = vld [vmem:[%s3590_s3 + $0x510] ss:$28 sps:$4 sm:$0xff]   ;;  %v2531_v15 = vld [vmem:[%s3590_s3 + $0x540] ss:$28 sps:$4 sm:$0xff]  }
  0x6d   :  { %v2533_v13 = vld [vmem:[%s3590_s3 + $0x544] ss:$28 sps:$4 sm:$0xff]   ;;  %v2536_v14 = vld [vmem:[%s3590_s3 + $0x54c] ss:$28 sps:$4 sm:$0xff]   ;;  %v2539_v17 = vld [vmem:[%s3590_s3 + $0x57c] ss:$28 sps:$4 sm:$0xff]  }
  0x6e   :  { %v2534_v16 = vld [vmem:[%s3590_s3 + $0x548] ss:$28 sps:$4 sm:$0xff]   ;;  %v2537_v19 = vld [vmem:[%s3590_s3 + $0x578] ss:$28 sps:$4 sm:$0xff]   ;;  %v2540_v20 = vld [vmem:[%s3590_s3 + $0x580] ss:$28 sps:$4 sm:$0xff]  }
  0x6f   :  { %v2542_v18 = vld [vmem:[%s3590_s3 + $0x584] ss:$28 sps:$4 sm:$0xff]   ;;  %v2545_v21 = vld [vmem:[%s3590_s3 + $0x5b4] ss:$28 sps:$4 sm:$0xff]  }
  0xe5   :  { %v180_v28 = vpop.f32.mrb[0].mxu1 }
  0xe6   :  { %v181_v29 = vadd.f32 %v180_v28, %v45_v26  ;;  %v182_v30 = vpop.f32.mrb[1].mxu1  ;;  %v2548_v26 = vld [vmem:[%s3590_s3 + $0x5bc] ss:$28 sps:$4 sm:$0xff]  }
  0xe7   :  { %v183_v31 = vadd.f32 %v182_v30, %v49_v27  ;;  %v184_v32 = vpop.f32.mrb[2].mxu1  ;;  %v2543_v27 = vld [vmem:[%s3590_s3 + $0x5b0] ss:$28 sps:$4 sm:$0xff]   ;;  %v2546_v28 = vld [vmem:[%s3590_s3 + $0x5b8] ss:$28 sps:$4 sm:$0xff]  }
  0xe8   :  { %v228_v33 = vmax.f32 %v181_v29, 0.0  ;;  %v185_v34 = vpop.f32.mrb[3].mxu1  ;;  %v2551_v29 = vld [vmem:[%s3590_s3 + $0x5ec] ss:$28 sps:$4 sm:$0xff]   ;;  %v2554_v30 = vld [vmem:[%s3590_s3 + $0x5f4] ss:$28 sps:$4 sm:$0xff]  }
  0xe9   :  { %v229_v35 = vmax.f32 %v183_v31, 0.0  ;;  %v2549_v31 = vld [vmem:[%s3590_s3 + $0x5e8] ss:$28 sps:$4 sm:$0xff]   ;;  %v2552_v32 = vld [vmem:[%s3590_s3 + $0x5f0] ss:$28 sps:$4 sm:$0xff]  }
  0xea   :  { %v3051_v39 = vpack.c.bf16 %v228_v33, %v228_v33  ;;  %v2557_v33 = vld [vmem:[%s3590_s3 + $0x624] ss:$28 sps:$4 sm:$0xff]   ;;  %v2560_v34 = vld [vmem:[%s3590_s3 + $0x62c] ss:$28 sps:$4 sm:$0xff]  }
  0xeb   :  { %v3043_v36 = vpack.c.bf16 %v229_v35, %v229_v35  ;;  %v52_v35 = vsub.s32 2, %v3028_v22 }
  0xed   :  { %1713 = vmatprep.mubr.bf16.mxu0 %v3043_v36  ;;  %1795 = vmatprep.mubr.bf16.mxu1 %v3043_v36 }
  0xee   :  { %1714 = vmatmul.mubr.bf16.vlgmr.msra.gmra.mrb[0].mxu0 %v3051_v39  ;;  %1796 = vmatmul.mubr.bf16.vlgmr.msra.gmra.mrb[8].mxu1 %v3051_v39 }
  0xef   :  { %1723 = vmatpush1.bf16.msra.mxu0 %v2483_v37  ;;  %1805 = vmatpush1.bf16.msra.mxu1 %v2486_v38  ;;  %v2555_v37 = vld [vmem:[%s3590_s3 + $0x620] ss:$28 sps:$4 sm:$0xff]   ;;  %v2558_v38 = vld [vmem:[%s3590_s3 + $0x628] ss:$28 sps:$4 sm:$0xff]  }
  0xf0   :  { %1724 = vmatprep.subr.bf16.mxu0 %v2491_v40  ;;  %1806 = vmatprep.subr.bf16.mxu1 %v2494_v41  ;;  %v2563_v40 = vld [vmem:[%s3590_s3 + $0x65c] ss:$28 sps:$4 sm:$0xff]   ;;  %v2566_v41 = vld [vmem:[%s3590_s3 + $0x664] ss:$28 sps:$4 sm:$0xff]  }
  0xf3   :  { %1725 = vmatpush1.bf16.msra.mxu0 %v2489_v42  ;;  %1807 = vmatpush1.bf16.msra.mxu1 %v2492_v43  ;;  %v53_v42 = vrot.slane %v3034_v24, %v52_v35  ;;  %v2561_v43 = vld [vmem:[%s3590_s3 + $0x658] ss:$28 sps:$4 sm:$0xff]  }
  0xf4   :  { %1726 = vmatprep.subr.bf16.mxu0 %v2497_v45  ;;  %1808 = vmatprep.subr.bf16.mxu1 %v2500_v46  ;;  %v2564_v45 = vld [vmem:[%s3590_s3 + $0x660] ss:$28 sps:$4 sm:$0xff]   ;;  %v2569_v46 = vld [vmem:[%s3590_s3 + $0x694] ss:$28 sps:$4 sm:$0xff]  }
  0xf5   :  { %v3091_v52 = vpop.f32.mrb[4].mxu1  ;;  %v2572_v24 = vld [vmem:[%s3590_s3 + $0x69c] ss:$28 sps:$4 sm:$0xff]  }
  0xf6   :  { %v223_v53 = vpop.f32.mrb[5].mxu1 }
  0xf7   :  { %1727 = vmatpush1.bf16.msra.mxu0 %v2495_v47  ;;  %1809 = vmatpush1.bf16.msra.mxu1 %v2498_v48  ;;  %v224_v56 = vadd.f32 %v223_v53, %v57_v49  ;;  %v225_v57 = vpop.f32.mrb[6].mxu1  ;;  %v222_v47 = vadd.f32 %v3091_v52, %v53_v42  ;;  %v2567_v48 = vld [vmem:[%s3590_s3 + $0x690] ss:$28 sps:$4 sm:$0xff]   ;;  %v2570_v49 = vld [vmem:[%s3590_s3 + $0x698] ss:$28 sps:$4 sm:$0xff]  }
  0xf8   :  { %1728 = vmatprep.subr.bf16.mxu0 %v2503_v50  ;;  %1810 = vmatprep.subr.bf16.mxu1 %v2506_v51  ;;  %v226_v60 = vpop.f32.mrb[7].mxu1  ;;  %v2575_v50 = vld [vmem:[%s3590_s3 + $0x6cc] ss:$28 sps:$4 sm:$0xff]   ;;  %v2578_v51 = vld [vmem:[%s3590_s3 + $0x6d4] ss:$28 sps:$4 sm:$0xff]  }
  0xf9   :  { %v231_v61 = vmax.f32 %v224_v56, 0.0  ;;  %v230_v52 = vmax.f32 %v222_v47, 0.0  ;;  %v2573_v53 = vld [vmem:[%s3590_s3 + $0x6c8] ss:$28 sps:$4 sm:$0xff]   ;;  %v2582_v56 = vld [vmem:[%s3590_s3 + $0x1d8] ss:$28 sps:$4 sm:$0xff]  }
  0xfa   :  { %v2586_v60 = vld [vmem:[%s3590_s3 + $0x4c] ss:$28 sps:$4 sm:$0xff]   ;;  %v2641_v47 = vld [vmem:[%s3590_s3 + $0x2b4] ss:$28 sps:$4 sm:$0xff]  }
  0xfb   :  { %1729 = vmatpush1.bf16.msra.mxu0 %v2501_v54  ;;  %1811 = vmatpush1.bf16.msra.mxu1 %v2504_v55  ;;  %v3111_v0 = vpack.c.bf16 %v231_v61, %v231_v61  ;;  %v2576_v54 = vld [vmem:[%s3590_s3 + $0x6d0] ss:$28 sps:$4 sm:$0xff]   ;;  %v3258_v57 = vpack.c.bf16 %v230_v52, %v230_v52  ;;  %v2633_v42 = vld [vmem:[%s3590_s3 + $0x408] ss:$28 sps:$4 sm:$0xff]  }
  0xfc   :  { %1730 = vmatprep.subr.bf16.mxu0 %v2509_v58  ;;  %1812 = vmatprep.subr.bf16.mxu1 %v2512_v59  ;;  %v2581_v55 = vld [vmem:[%s3590_s3 + $0x14] ss:$28 sps:$4 sm:$0xff]  }
  0xfd   :  { %1754 = vmatprep.mubr.bf16.mxu0 %v3111_v0  ;;  %1836 = vmatprep.mubr.bf16.mxu1 %v3111_v0  ;;  %v2579_v58 = vld [vmem:[%s3590_s3 + $0x10] ss:$28 sps:$4 sm:$0xff]   ;;  %v2583_v59 = vld [vmem:[%s3590_s3 + $0x18] ss:$28 sps:$4 sm:$0xff]  }
  0xfe   :  { %v2587_v61 = vld [vmem:[%s3590_s3 + $0x210] ss:$28 sps:$4 sm:$0xff]  }
  0xff   :  { %1731 = vmatpush1.bf16.msra.mxu0 %v2507_v62  ;;  %1813 = vmatpush1.bf16.msra.mxu1 %v2510_v63  ;;  %v2584_v62 = vld [vmem:[%s3590_s3 + $0x48] ss:$28 sps:$4 sm:$0xff]   ;;  %v2588_v63 = vld [vmem:[%s3590_s3 + $0x50] ss:$28 sps:$4 sm:$0xff]  }
 0x100   :  { %1732 = vmatprep.subr.bf16.mxu0 %v2515_v1  ;;  %1814 = vmatprep.subr.bf16.mxu1 %v2518_v2  ;;  %v2591_v1 = vld [vmem:[%s3590_s3 + $0x84] ss:$28 sps:$4 sm:$0xff]   ;;  %v2647_v52 = vld [vmem:[%s3590_s3 + $0x670] ss:$28 sps:$4 sm:$0xff]  }
 0x101   :  { %v2592_v2 = vld [vmem:[%s3590_s3 + $0x248] ss:$28 sps:$4 sm:$0xff]  }
 0x103   :  { %1733 = vmatpush1.bf16.msra.mxu0 %v2513_v3  ;;  %1815 = vmatpush1.bf16.msra.mxu1 %v2516_v4  ;;  %v2589_v3 = vld [vmem:[%s3590_s3 + $0x80] ss:$28 sps:$4 sm:$0xff]  }
 0x104   :  { %1734 = vmatprep.subr.bf16.mxu0 %v2521_v5  ;;  %1816 = vmatprep.subr.bf16.mxu1 %v2524_v6  ;;  %v2596_v4 = vld [vmem:[%s3590_s3 + $0xbc] ss:$28 sps:$4 sm:$0xff]  }
 0x105   :  { %v2597_v5 = vld [vmem:[%s3590_s3 + $0x280] ss:$28 sps:$4 sm:$0xff]   ;;  %v2594_v6 = vld [vmem:[%s3590_s3 + $0xb8] ss:$28 sps:$4 sm:$0xff]  }
 0x107   :  { %1735 = vmatpush1.bf16.msra.mxu0 %v2519_v7  ;;  %1817 = vmatpush1.bf16.msra.mxu1 %v2522_v8  ;;  %v2598_v7 = vld [vmem:[%s3590_s3 + $0xc0] ss:$28 sps:$4 sm:$0xff]   ;;  %v2601_v8 = vld [vmem:[%s3590_s3 + $0xf4] ss:$28 sps:$4 sm:$0xff]  }
 0x108   :  { %1736 = vmatprep.subr.bf16.mxu0 %v2527_v9  ;;  %1818 = vmatprep.subr.bf16.mxu1 %v2530_v10  ;;  %v2602_v9 = vld [vmem:[%s3590_s3 + $0x2b8] ss:$28 sps:$4 sm:$0xff]   ;;  %v2599_v10 = vld [vmem:[%s3590_s3 + $0xf0] ss:$28 sps:$4 sm:$0xff]  }
 0x10b   :  { %1737 = vmatpush1.bf16.msra.mxu0 %v2525_v11  ;;  %1819 = vmatpush1.bf16.msra.mxu1 %v2528_v12  ;;  %v2603_v11 = vld [vmem:[%s3590_s3 + $0xf8] ss:$28 sps:$4 sm:$0xff]   ;;  %v2606_v12 = vld [vmem:[%s3590_s3 + $0x12c] ss:$28 sps:$4 sm:$0xff]  }
 0x10c   :  { %1738 = vmatprep.subr.bf16.mxu0 %v2533_v13  ;;  %1820 = vmatprep.subr.bf16.mxu1 %v2536_v14  ;;  %v2607_v13 = vld [vmem:[%s3590_s3 + $0x2f0] ss:$28 sps:$4 sm:$0xff]   ;;  %v2604_v14 = vld [vmem:[%s3590_s3 + $0x128] ss:$28 sps:$4 sm:$0xff]  }
 0x10f   :  { %1739 = vmatpush1.bf16.msra.mxu0 %v2531_v15  ;;  %1821 = vmatpush1.bf16.msra.mxu1 %v2534_v16  ;;  %v2608_v15 = vld [vmem:[%s3590_s3 + $0x130] ss:$28 sps:$4 sm:$0xff]   ;;  %v2611_v16 = vld [vmem:[%s3590_s3 + $0x164] ss:$28 sps:$4 sm:$0xff]  }
 0x110   :  { %1740 = vmatprep.subr.bf16.mxu0 %v2539_v17  ;;  %1822 = vmatprep.subr.bf16.mxu1 %v2542_v18  ;;  %v2612_v17 = vld [vmem:[%s3590_s3 + $0x328] ss:$28 sps:$4 sm:$0xff]   ;;  %v2609_v18 = vld [vmem:[%s3590_s3 + $0x160] ss:$28 sps:$4 sm:$0xff]  }
 0x113   :  { %1741 = vmatpush1.bf16.msra.mxu0 %v2537_v19  ;;  %1823 = vmatpush1.bf16.msra.mxu1 %v2540_v20  ;;  %v2613_v19 = vld [vmem:[%s3590_s3 + $0x168] ss:$28 sps:$4 sm:$0xff]   ;;  %v2616_v20 = vld [vmem:[%s3590_s3 + $0x19c] ss:$28 sps:$4 sm:$0xff]  }
 0x114   :  { %1742 = vmatprep.subr.bf16.mxu0 %v2545_v21  ;;  %1824 = vmatprep.subr.bf16.mxu1 %v2548_v26  ;;  %v2617_v21 = vld [vmem:[%s3590_s3 + $0x360] ss:$28 sps:$4 sm:$0xff]   ;;  %v2614_v26 = vld [vmem:[%s3590_s3 + $0x198] ss:$28 sps:$4 sm:$0xff]  }
 0x117   :  { %1743 = vmatpush1.bf16.msra.mxu0 %v2543_v27  ;;  %1825 = vmatpush1.bf16.msra.mxu1 %v2546_v28  ;;  %v2618_v27 = vld [vmem:[%s3590_s3 + $0x1a0] ss:$28 sps:$4 sm:$0xff]   ;;  %v2621_v28 = vld [vmem:[%s3590_s3 + $0x1d4] ss:$28 sps:$4 sm:$0xff]  }
 0x118   :  { %1744 = vmatprep.subr.bf16.mxu0 %v2551_v29  ;;  %1826 = vmatprep.subr.bf16.mxu1 %v2554_v30  ;;  %v2622_v29 = vld [vmem:[%s3590_s3 + $0x558] ss:$28 sps:$4 sm:$0xff]   ;;  %v2619_v30 = vld [vmem:[%s3590_s3 + $0x1d0] ss:$28 sps:$4 sm:$0xff]  }
 0x11b   :  { %1745 = vmatpush1.bf16.msra.mxu0 %v2549_v31  ;;  %1827 = vmatpush1.bf16.msra.mxu1 %v2552_v32  ;;  %v2623_v31 = vld [vmem:[%s3590_s3 + $0x398] ss:$28 sps:$4 sm:$0xff]   ;;  %v2626_v32 = vld [vmem:[%s3590_s3 + $0x20c] ss:$28 sps:$4 sm:$0xff]  }
 0x11c   :  { %1746 = vmatprep.subr.bf16.mxu0 %v2557_v33  ;;  %1828 = vmatprep.subr.bf16.mxu1 %v2560_v34  ;;  %v2627_v33 = vld [vmem:[%s3590_s3 + $0x590] ss:$28 sps:$4 sm:$0xff]   ;;  %v2624_v34 = vld [vmem:[%s3590_s3 + $0x208] ss:$28 sps:$4 sm:$0xff]  }
 0x11f   :  { %1747 = vmatpush1.bf16.msra.mxu0 %v2555_v37  ;;  %1829 = vmatpush1.bf16.msra.mxu1 %v2558_v38  ;;  %v2628_v37 = vld [vmem:[%s3590_s3 + $0x3d0] ss:$28 sps:$4 sm:$0xff]   ;;  %v2631_v38 = vld [vmem:[%s3590_s3 + $0x244] ss:$28 sps:$4 sm:$0xff]  }
 0x120   :  { %1748 = vmatprep.subr.bf16.mxu0 %v2563_v40  ;;  %1830 = vmatprep.subr.bf16.mxu1 %v2566_v41  ;;  %v2632_v40 = vld [vmem:[%s3590_s3 + $0x5c8] ss:$28 sps:$4 sm:$0xff]   ;;  %v2629_v41 = vld [vmem:[%s3590_s3 + $0x240] ss:$28 sps:$4 sm:$0xff]  }
 0x123   :  { %1749 = vmatpush1.bf16.msra.mxu0 %v2561_v43  ;;  %1831 = vmatpush1.bf16.msra.mxu1 %v2564_v45  ;;  %v2636_v43 = vld [vmem:[%s3590_s3 + $0x27c] ss:$28 sps:$4 sm:$0xff]  }
 0x124   :  { %1750 = vmatprep.subr.bf16.mxu0 %v2569_v46  ;;  %1832 = vmatprep.subr.bf16.mxu1 %v2572_v24  ;;  %v2637_v45 = vld [vmem:[%s3590_s3 + $0x600] ss:$28 sps:$4 sm:$0xff]   ;;  %v2634_v46 = vld [vmem:[%s3590_s3 + $0x278] ss:$28 sps:$4 sm:$0xff]  }
 0x125   :  { %v2638_v24 = vld [vmem:[%s3590_s3 + $0x440] ss:$28 sps:$4 sm:$0xff]  }
 0x127   :  { %1751 = vmatpush1.bf16.msra.mxu0 %v2567_v48  ;;  %1833 = vmatpush1.bf16.msra.mxu1 %v2570_v49  ;;  %v2642_v48 = vld [vmem:[%s3590_s3 + $0x638] ss:$28 sps:$4 sm:$0xff]   ;;  %v2639_v49 = vld [vmem:[%s3590_s3 + $0x2b0] ss:$28 sps:$4 sm:$0xff]  }
 0x128   :  { %1752 = vmatprep.subr.bf16.mxu0 %v2575_v50  ;;  %1834 = vmatprep.subr.bf16.mxu1 %v2578_v51  ;;  %v2643_v50 = vld [vmem:[%s3590_s3 + $0x478] ss:$28 sps:$4 sm:$0xff]   ;;  %v2646_v51 = vld [vmem:[%s3590_s3 + $0x2ec] ss:$28 sps:$4 sm:$0xff]  }
 0x12b   :  { %1753 = vmatpush1.bf16.msra.mxu0 %v2573_v53  ;;  %1835 = vmatpush1.bf16.msra.mxu1 %v2576_v54  ;;  %v2644_v53 = vld [vmem:[%s3590_s3 + $0x2e8] ss:$28 sps:$4 sm:$0xff]   ;;  %v2648_v54 = vld [vmem:[%s3590_s3 + $0x4b0] ss:$28 sps:$4 sm:$0xff]  }
 0x12c   :  { %1845 = vmatprep.subr.bf16.mxu0 %v2581_v55  ;;  %2299 = vmatprep.subr.bf16.mxu1 %v2582_v56  ;;  %v2651_v55 = vld [vmem:[%s3590_s3 + $0x324] ss:$28 sps:$4 sm:$0xff]  }
 0x12d   :  { %v2652_v56 = vld [vmem:[%s3590_s3 + $0x6a8] ss:$28 sps:$4 sm:$0xff]  }
 0x12e   :  { %1755 = vmatmul.mubr.bf16.vlgmr.msra.gmra.mrb[0].mxu0 %v3258_v57  ;;  %1837 = vmatmul.mubr.bf16.vlgmr.msra.gmra.mrb[8].mxu1 %v3258_v57 }
 0x12f   :  { %1846 = vmatpush1.bf16.msra.mxu0 %v2579_v58  ;;  %1877 = vmatprep.mubr.bf16.mxu0 %v3043_v36  ;;  %v2649_v58 = vld [vmem:[%s3590_s3 + $0x320] ss:$28 sps:$4 sm:$0xff]  }
 0x130   :  { %2300 = vmatpush3.bf16.msra.mxu1 %v2583_v59  ;;  %1959 = vmatprep.mubr.bf16.mxu1 %v3043_v36  ;;  %v2593_v36 = vld [vmem:[%s3590_s3 + $0x88] ss:$28 sps:$4 sm:$0xff]  }
 0x131   :  { %1847 = vmatprep.subr.bf16.mxu0 %v2586_v60  ;;  %2301 = vmatprep.subr.bf16.mxu1 %v2587_v61  ;;  %v2653_v59 = vld [vmem:[%s3590_s3 + $0x4e8] ss:$28 sps:$4 sm:$0xff]   ;;  %v2656_v60 = vld [vmem:[%s3590_s3 + $0x35c] ss:$28 sps:$4 sm:$0xff]  }
 0x132   :  { %v2657_v61 = vld [vmem:[%s3590_s3 + $0x6e0] ss:$28 sps:$4 sm:$0xff]  }
 0x133   :  { %1848 = vmatpush1.bf16.msra.mxu0 %v2584_v62  ;;  %v2654_v62 = vld [vmem:[%s3590_s3 + $0x358] ss:$28 sps:$4 sm:$0xff]  }
 0x134   :  { %2302 = vmatpush3.bf16.msra.mxu1 %v2588_v63  ;;  %1849 = vmatprep.subr.bf16.mxu0 %v2591_v1  ;;  %v2658_v63 = vld [vmem:[%s3590_s3 + $0x520] ss:$28 sps:$4 sm:$0xff]   ;;  %v2661_v1 = vld [vmem:[%s3590_s3 + $0x394] ss:$28 sps:$4 sm:$0xff]  }
 0x135   :  { %2303 = vmatprep.subr.bf16.mxu1 %v2592_v2  ;;  %v2659_v2 = vld [vmem:[%s3590_s3 + $0x390] ss:$28 sps:$4 sm:$0xff]  }
 0x137   :  { %1850 = vmatpush1.bf16.msra.mxu0 %v2589_v3  ;;  %v2664_v3 = vld [vmem:[%s3590_s3 + $0x3cc] ss:$28 sps:$4 sm:$0xff]  }
 0x138   :  { %2304 = vmatpush3.bf16.msra.mxu1 %v2593_v36  ;;  %1851 = vmatprep.subr.bf16.mxu0 %v2596_v4  ;;  %v2662_v36 = vld [vmem:[%s3590_s3 + $0x3c8] ss:$28 sps:$4 sm:$0xff]  }
 0x139   :  { %2305 = vmatprep.subr.bf16.mxu1 %v2597_v5  ;;  %v2667_v4 = vld [vmem:[%s3590_s3 + $0x404] ss:$28 sps:$4 sm:$0xff]  }
 0x13a   :  { %v2665_v5 = vld [vmem:[%s3590_s3 + $0x400] ss:$28 sps:$4 sm:$0xff]  }
 0x13b   :  { %1852 = vmatpush1.bf16.msra.mxu0 %v2594_v6  ;;  %v2673_v6 = vld [vmem:[%s3590_s3 + $0x474] ss:$28 sps:$4 sm:$0xff]  }
 0x13c   :  { %2306 = vmatpush3.bf16.msra.mxu1 %v2598_v7  ;;  %1853 = vmatprep.subr.bf16.mxu0 %v2601_v8  ;;  %v2671_v7 = vld [vmem:[%s3590_s3 + $0x470] ss:$28 sps:$4 sm:$0xff]  }
 0x13d   :  { %2307 = vmatprep.subr.bf16.mxu1 %v2602_v9  ;;  %v2676_v8 = vld [vmem:[%s3590_s3 + $0x4ac] ss:$28 sps:$4 sm:$0xff]  }
 0x13e   :  { %v2674_v9 = vld [vmem:[%s3590_s3 + $0x4a8] ss:$28 sps:$4 sm:$0xff]  }
 0x13f   :  { %1854 = vmatpush1.bf16.msra.mxu0 %v2599_v10  ;;  %v2679_v10 = vld [vmem:[%s3590_s3 + $0x4e4] ss:$28 sps:$4 sm:$0xff]  }
 0x140   :  { %2308 = vmatpush3.bf16.msra.mxu1 %v2603_v11  ;;  %1855 = vmatprep.subr.bf16.mxu0 %v2606_v12  ;;  %v2677_v11 = vld [vmem:[%s3590_s3 + $0x4e0] ss:$28 sps:$4 sm:$0xff]  }
 0x141   :  { %2309 = vmatprep.subr.bf16.mxu1 %v2607_v13  ;;  %v2682_v12 = vld [vmem:[%s3590_s3 + $0x51c] ss:$28 sps:$4 sm:$0xff]  }
 0x142   :  { %v2680_v13 = vld [vmem:[%s3590_s3 + $0x518] ss:$28 sps:$4 sm:$0xff]  }
 0x143   :  { %1856 = vmatpush1.bf16.msra.mxu0 %v2604_v14  ;;  %v2685_v14 = vld [vmem:[%s3590_s3 + $0x554] ss:$28 sps:$4 sm:$0xff]  }
 0x144   :  { %2310 = vmatpush3.bf16.msra.mxu1 %v2608_v15  ;;  %1857 = vmatprep.subr.bf16.mxu0 %v2611_v16  ;;  %v2683_v15 = vld [vmem:[%s3590_s3 + $0x550] ss:$28 sps:$4 sm:$0xff]  }
 0x145   :  { %2311 = vmatprep.subr.bf16.mxu1 %v2612_v17  ;;  %v2688_v16 = vld [vmem:[%s3590_s3 + $0x58c] ss:$28 sps:$4 sm:$0xff]  }
 0x146   :  { %v2686_v17 = vld [vmem:[%s3590_s3 + $0x588] ss:$28 sps:$4 sm:$0xff]  }
 0x147   :  { %1858 = vmatpush1.bf16.msra.mxu0 %v2609_v18  ;;  %v2691_v18 = vld [vmem:[%s3590_s3 + $0x5c4] ss:$28 sps:$4 sm:$0xff]  }
 0x148   :  { %2312 = vmatpush3.bf16.msra.mxu1 %v2613_v19  ;;  %1859 = vmatprep.subr.bf16.mxu0 %v2616_v20  ;;  %v2689_v19 = vld [vmem:[%s3590_s3 + $0x5c0] ss:$28 sps:$4 sm:$0xff]  }
 0x149   :  { %2313 = vmatprep.subr.bf16.mxu1 %v2617_v21  ;;  %v2694_v20 = vld [vmem:[%s3590_s3 + $0x5fc] ss:$28 sps:$4 sm:$0xff]  }
 0x14a   :  { %v2692_v21 = vld [vmem:[%s3590_s3 + $0x5f8] ss:$28 sps:$4 sm:$0xff]  }
 0x14b   :  { %1860 = vmatpush1.bf16.msra.mxu0 %v2614_v26  ;;  %v2697_v26 = vld [vmem:[%s3590_s3 + $0x634] ss:$28 sps:$4 sm:$0xff]  }
 0x14c   :  { %2314 = vmatpush3.bf16.msra.mxu1 %v2618_v27  ;;  %1861 = vmatprep.subr.bf16.mxu0 %v2621_v28  ;;  %v2695_v27 = vld [vmem:[%s3590_s3 + $0x630] ss:$28 sps:$4 sm:$0xff]  }
 0x14d   :  { %2321 = vmatprep.subr.bf16.mxu1 %v2622_v29  ;;  %v2700_v28 = vld [vmem:[%s3590_s3 + $0x66c] ss:$28 sps:$4 sm:$0xff]  }
 0x14e   :  { %v2698_v29 = vld [vmem:[%s3590_s3 + $0x668] ss:$28 sps:$4 sm:$0xff]  }
 0x14f   :  { %1960 = vmatmul.mubr.bf16.vlgmr.msra.gmra.mrb[12].mxu1 %v3051_v39  ;;  %1862 = vmatpush1.bf16.msra.mxu0 %v2619_v30  ;;  %v2703_v30 = vld [vmem:[%s3590_s3 + $0x6a4] ss:$28 sps:$4 sm:$0xff]  }
 0x150   :  { %2322 = vmatpush3.bf16.msra.mxu1 %v2623_v31  ;;  %1999 = vmatprep.mubr.bf16.mxu1 %v3111_v0  ;;  %v2701_v31 = vld [vmem:[%s3590_s3 + $0x6a0] ss:$28 sps:$4 sm:$0xff]  }
 0x151   :  { %1863 = vmatprep.subr.bf16.mxu0 %v2626_v32  ;;  %2323 = vmatprep.subr.bf16.mxu1 %v2627_v33  ;;  %v2706_v32 = vld [vmem:[%s3590_s3 + $0x6dc] ss:$28 sps:$4 sm:$0xff]  }
 0x152   :  { %v2704_v33 = vld [vmem:[%s3590_s3 + $0x6d8] ss:$28 sps:$4 sm:$0xff]  }
 0x153   :  { %1864 = vmatpush1.bf16.msra.mxu0 %v2624_v34  ;;  %v3555_v34 = vld [vmem:[%s3591_s4] sm:$0x7f] }
 0x154   :  { %2324 = vmatpush3.bf16.msra.mxu1 %v2628_v37  ;;  %1865 = vmatprep.subr.bf16.mxu0 %v2631_v38  ;;  %v497_v37 = vrot.slane %v3555_v34, %v44_v23  ;;  %v505_v38 = vrot.slane %v3555_v34, %v52_v35 }
 0x155   :  { %2325 = vmatprep.subr.bf16.mxu1 %v2632_v40  ;;  %v501_v40 = vrot.slane %v3555_v34, %v48_v25 }
 0x157   :  { %1866 = vmatpush1.bf16.msra.mxu0 %v2629_v41 }
 0x158   :  { %2326 = vmatpush3.bf16.msra.mxu1 %v2633_v42  ;;  %1867 = vmatprep.subr.bf16.mxu0 %v2636_v43 }
 0x159   :  { %2327 = vmatprep.subr.bf16.mxu1 %v2637_v45 }
 0x15b   :  { %1868 = vmatpush1.bf16.msra.mxu0 %v2634_v46 }
 0x15c   :  { %2328 = vmatpush3.bf16.msra.mxu1 %v2638_v24  ;;  %1869 = vmatprep.subr.bf16.mxu0 %v2641_v47 }
 0x15d   :  { %2329 = vmatprep.subr.bf16.mxu1 %v2642_v48 }
 0x15f   :  { %1870 = vmatpush1.bf16.msra.mxu0 %v2639_v49 }
 0x160   :  { %2330 = vmatpush3.bf16.msra.mxu1 %v2643_v50  ;;  %1871 = vmatprep.subr.bf16.mxu0 %v2646_v51 }
 0x161   :  { %2331 = vmatprep.subr.bf16.mxu1 %v2647_v52 }
 0x163   :  { %1872 = vmatpush1.bf16.msra.mxu0 %v2644_v53 }
 0x164   :  { %2332 = vmatpush3.bf16.msra.mxu1 %v2648_v54  ;;  %1873 = vmatprep.subr.bf16.mxu0 %v2651_v55 }
 0x165   :  { %2333 = vmatprep.subr.bf16.mxu1 %v2652_v56 }
 0x167   :  { %1874 = vmatpush1.bf16.msra.mxu0 %v2649_v58 }
 0x168   :  { %2334 = vmatpush3.bf16.msra.mxu1 %v2653_v59  ;;  %1875 = vmatprep.subr.bf16.mxu0 %v2656_v60 }
 0x169   :  { %2335 = vmatprep.subr.bf16.mxu1 %v2657_v61 }
 0x16b   :  { %1876 = vmatpush1.bf16.msra.mxu0 %v2654_v62 }
 0x16c   :  { %2336 = vmatpush3.bf16.msra.mxu1 %v2658_v63  ;;  %1886 = vmatprep.subr.bf16.mxu0 %v2661_v1 }
 0x16e   :  { %1878 = vmatmul.mubr.bf16.vlgmr.msra.gmra.mrb[4].mxu0 %v3051_v39  ;;  %v2670_v39 = vld [vmem:[%s3590_s3 + $0x43c] ss:$28 sps:$4 sm:$0xff]  }
 0x16f   :  { %2000 = vmatmul.mubr.bf16.vlgmr.msra.gmra.mrb[16].mxu1 %v3258_v57  ;;  %1887 = vmatpush1.bf16.msra.mxu0 %v2659_v2 }
 0x170   :  { %1918 = vmatprep.mubr.bf16.mxu0 %v3111_v0  ;;  %1888 = vmatprep.subr.bf16.mxu0 %v2664_v3  ;;  %v2668_v0 = vld [vmem:[%s3590_s3 + $0x438] ss:$28 sps:$4 sm:$0xff]   ;;  %s2746_s3 = smov [#allocation2]  }
 0x171   :  { %s2049_s4 = sshll.u32 %s2746_s3, 4  ;;  %s2050_s4 = int_to_ptr.vmem [resolvable:$true] %s2049_s4 }
 0x172   :  { %s2721_s9 = scalar_lea.vmem %s2050_s4, 896  ;;  %p2726_p1 = scmp.lt.s32.totalorder %s2050_s4, %s2050_s4 }
 0x173   :  { %1889 = vmatpush1.bf16.msra.mxu0 %v2662_v36  ;;  %p2722_p0 = scmp.ne.s32.totalorder %s2050_s4, %s2721_s9  ;;  %p2727_p2 = scmp.lt.s32.totalorder %s2721_s9, %s2721_s9 }
 0x174   :  { %1890 = vmatprep.subr.bf16.mxu0 %v2667_v4 }
 0x175   :  { %p2728_p3 = por %p2727_p2, %p2726_p1 }
 0x177   :  { %1891 = vmatpush1.bf16.msra.mxu0 %v2665_v5  ;;  %p2729_p4 = pnand %p2728_p3, %p2722_p0 }
 0x178   :  { %1892 = vmatprep.subr.bf16.mxu0 %v2670_v39 }
 0x17b   :  { %1893 = vmatpush1.bf16.msra.mxu0 %v2668_v0  ;;  %v520_v0 = vsub.s32 6, %v3028_v22 }
 0x17c   :  { %1894 = vmatprep.subr.bf16.mxu0 %v2673_v6 }
 0x17d   :  { %v521_v6 = vrot.slane %v3555_v34, %v520_v0 }
 0x17f   :  { %1895 = vmatpush1.bf16.msra.mxu0 %v2671_v7 }
 0x180   :  { %1896 = vmatprep.subr.bf16.mxu0 %v2676_v8 }
 0x183   :  { %1897 = vmatpush1.bf16.msra.mxu0 %v2674_v9 }
 0x184   :  { %1898 = vmatprep.subr.bf16.mxu0 %v2679_v10 }
 0x187   :  { %1899 = vmatpush1.bf16.msra.mxu0 %v2677_v11 }
 0x188   :  { %1900 = vmatprep.subr.bf16.mxu0 %v2682_v12 }
 0x18b   :  { %1901 = vmatpush1.bf16.msra.mxu0 %v2680_v13 }
 0x18c   :  { %1902 = vmatprep.subr.bf16.mxu0 %v2685_v14 }
 0x18f   :  { %1903 = vmatpush1.bf16.msra.mxu0 %v2683_v15 }
 0x190   :  { %1904 = vmatprep.subr.bf16.mxu0 %v2688_v16 }
 0x193   :  { %1905 = vmatpush1.bf16.msra.mxu0 %v2686_v17 }
 0x194   :  { %1906 = vmatprep.subr.bf16.mxu0 %v2691_v18  ;;  %v512_v18 = vsub.s32 4, %v3028_v22 }
 0x197   :  { %1907 = vmatpush1.bf16.msra.mxu0 %v2689_v19  ;;  %v516_v19 = vsub.s32 5, %v3028_v22 }
 0x198   :  { %1908 = vmatprep.subr.bf16.mxu0 %v2694_v20  ;;  %v513_v20 = vrot.slane %v3555_v34, %v512_v18 }
 0x19b   :  { %1909 = vmatpush1.bf16.msra.mxu0 %v2692_v21  ;;  %v517_v21 = vrot.slane %v3555_v34, %v516_v19 }
 0x19c   :  { %1910 = vmatprep.subr.bf16.mxu0 %v2697_v26 }
 0x19f   :  { %1911 = vmatpush1.bf16.msra.mxu0 %v2695_v27 }
 0x1a0   :  { %1912 = vmatprep.subr.bf16.mxu0 %v2700_v28 }
 0x1a3   :  { %1913 = vmatpush1.bf16.msra.mxu0 %v2698_v29 }
 0x1a4   :  { %1914 = vmatprep.subr.bf16.mxu0 %v2703_v30 }
 0x1a7   :  { %1915 = vmatpush1.bf16.msra.mxu0 %v2701_v31 }
 0x1a8   :  { %1916 = vmatprep.subr.bf16.mxu0 %v2706_v32 }
 0x1ab   :  { %1917 = vmatpush1.bf16.msra.mxu0 %v2704_v33 }
 0x1ae   :  { %1919 = vmatmul.mubr.bf16.vlgmr.msra.gmra.mrb[4].mxu0 %v3258_v57  ;;  %v509_v57 = vrot.slane %v3555_v34, %v56_v44 }
 0x201   :  { %v1756_v41 = vpop.f32.mrb[0].mxu0  ;;  %v1838_v42 = vpop.f32.mrb[8].mxu1 }
 0x202   :  { %v2343_v43 = vadd.f32 %v1756_v41, %v497_v37  ;;  %v2345_v45 = vadd.f32 %v1838_v42, %v505_v38  ;;  %v1758_v46 = vpop.f32.mrb[1].mxu0  ;;  %v1840_v24 = vpop.f32.mrb[9].mxu1 }
 0x203   :  { %v2344_v47 = vadd.f32 %v1758_v46, %v501_v40  ;;  %v2346_v23 = vadd.f32 %v1840_v24, %v509_v57  ;;  %v1760_v48 = vpop.f32.mrb[2].mxu0  ;;  %v1842_v49 = vpop.f32.mrb[10].mxu1 }
 0x204   :  { %v2007_v50 = vmul.f32 0.5, %v2343_v43  ;;  %v2009_v35 = vmul.f32 0.5, %v2345_v45  ;;  %v1761_v51 = vpop.f32.mrb[3].mxu0  ;;  %v1843_v52 = vpop.f32.mrb[11].mxu1 }
 0x205   :  { %v2008_v53 = vmul.f32 0.5, %v2344_v47  ;;  %v2010_v25 = vmul.f32 0.5, %v2346_v23 }
 0x206   :  { %2707 = vtanh.f32 %v2007_v50 }
 0x207   :  { %2709 = vtanh.f32 %v2009_v35 }
 0x208   :  { %2711 = vtanh.f32 %v2008_v53 }
 0x209   :  { %2713 = vtanh.f32 %v2010_v25 }
 0x210   :  { %v2708_v44 = vpop.eup %2707 }
 0x211   :  { %v2710_v54 = vpop.eup %2709  ;;  %v2021_v55 = vmul.f32 0.5, %v2708_v44 }
 0x212   :  { %v2712_v56 = vpop.eup %2711  ;;  %v2023_v58 = vmul.f32 0.5, %v2710_v54 }
 0x213   :  { %v2714_v59 = vpop.eup %2713  ;;  %v2028_v60 = vadd.f32 0.5, %v2021_v55  ;;  %v2022_v61 = vmul.f32 0.5, %v2712_v56 }
 0x214   :  { %v2030_v62 = vadd.f32 0.5, %v2023_v58  ;;  %v2024_v63 = vmul.f32 0.5, %v2714_v59 }
 0x215   :  { %2035 = vst [vmem:[#allocation2] sm:$0xff] %v2028_v60  ;;  %v2029_v1 = vadd.f32 0.5, %v2022_v61 }
 0x216   :  { %2037 = vst [vmem:[#allocation2 + $0x10] sm:$0xff] %v2030_v62  ;;  %v2031_v2 = vadd.f32 0.5, %v2024_v63 }
 0x217   :  { %2036 = vst [vmem:[#allocation2 + $0x8] sm:$0xff] %v2029_v1 }
 0x218   :  { %2038 = vst [vmem:[#allocation2 + $0x18] sm:$0xff] %v2031_v2 }
 0x222   :  { %v2315_v3 = vpop.f32.mrb[12].mxu1 }
 0x223   :  { %v2316_v36 = vpop.f32.mrb[13].mxu1 }
 0x224   :  { %v2317_v4 = vadd.f32 %v2316_v36, %v2315_v3  ;;  %v2318_v5 = vpop.f32.mrb[14].mxu1 }
 0x225   :  { %v2319_v39 = vpop.f32.mrb[15].mxu1 }
 0x226   :  { %v1962_v9 = vadd.f32 %v2317_v4, %v521_v6 }
 0x242   :  { %v2337_v7 = vpop.f32.mrb[16].mxu1 }
 0x243   :  { %v2338_v8 = vpop.f32.mrb[17].mxu1 }
 0x244   :  { %v2339_v10 = vadd.f32 %v2338_v8, %v2337_v7  ;;  %v2340_v11 = vpop.f32.mrb[18].mxu1 }
 0x245   :  { %v2341_v12 = vpop.f32.mrb[19].mxu1 }
 0x246   :  { %v2002_v13 = vadd.f32 %v2339_v10, %v1962_v9 }
 0x248   :  { %v2013_v14 = vmul.f32 0.5, %v2002_v13 }
 0x24a   :  { %2715 = vtanh.f32 %v2013_v14 }
 0x254   :  { %v2716_v15 = vpop.eup %2715 }
 0x255   :  { %v2027_v16 = vmul.f32 0.5, %v2716_v15 }
 0x257   :  { %v2034_v17 = vadd.f32 0.5, %v2027_v16 }
 0x259   :  { %2042 = vst.msk [vmem:[#allocation2 + $0x30] sm:$0xff] %vm2041_vm1, %v2034_v17 }
 0x281   :  { %v1920_v26 = vpop.f32.mrb[4].mxu0 }
 0x282   :  { %v2347_v27 = vadd.f32 %v1920_v26, %v513_v20  ;;  %v1922_v28 = vpop.f32.mrb[5].mxu0 }
 0x283   :  { %v2348_v29 = vadd.f32 %v1922_v28, %v517_v21  ;;  %v1924_v30 = vpop.f32.mrb[6].mxu0 }
 0x284   :  { %v2011_v31 = vmul.f32 0.5, %v2347_v27  ;;  %v1925_v32 = vpop.f32.mrb[7].mxu0 }
 0x285   :  { %v2012_v33 = vmul.f32 0.5, %v2348_v29 }
 0x286   :  { %2717 = vtanh.f32 %v2011_v31 }
 0x287   :  { %2719 = vtanh.f32 %v2012_v33 }
 0x290   :  { %v2718_v37 = vpop.eup %2717 }
 0x291   :  { %v2720_v38 = vpop.eup %2719  ;;  %v2025_v40 = vmul.f32 0.5, %v2718_v37 }
 0x292   :  { %v2026_v22 = vmul.f32 0.5, %v2720_v38 }
 0x293   :  { %v2032_v57 = vadd.f32 0.5, %v2025_v40 }
 0x294   :  { %v2033_v41 = vadd.f32 0.5, %v2026_v22 }
 0x295   :  { %2039 = vst [vmem:[#allocation2 + $0x20] sm:$0xff] %v2032_v57 }
 0x296   :  { %2040 = vst [vmem:[#allocation2 + $0x28] sm:$0xff] %v2033_v41 }
 0x297   :  { %2732 = shalt.err (!%p2729_p4)
}
 0x298   :  { %s2733_s12 = scalar_lea.hbm %s3592_s5, 896 }
 0x299   :  { %p2734_p5 = scmp.ne.s32.totalorder %s3592_s5, %s2733_s12  ;;  %p2737_p6 = scmp.lt.u32.totalorder %s2733_s12, %s3592_s5 }
 0x29b   :  { %p2739_p7 = pnand %p2737_p6, %p2734_p5 }
 0x29d   :  { %2742 = shalt.err (!%p2739_p7)
}
 0x29e   :  { %2052 = dma.vmem_to_hbm [thread:$0]  %s2050_s4, 896, %s3592_s5, [#allocation3]  }
 0x29f   :  { %2743 = dma.done.wait [#allocation3], 896  }
 0x2a0   :  { %2744 = vsyncadd [#allocation3], 4294966400 }
 0x2a1   :  { %2056 = vsyncpa [#allocation3], 1 }

</bundles_post_ra>
